<compile_context>
chip_gen: v5e
topology: v5e:2x2
jax: 0.10.0
libtpu: 0.0.40
codegen_flags: <defaults>
</compile_context>

<pallas_src>
import jax
import jax.numpy as jnp
from jax.experimental import pallas as pl
from jax.experimental.pallas import tpu as pltpu


# ---------------------------------------------------------------------------
# Exact-semantics port of encoder.forward(): no inputs, no outputs.
# ---------------------------------------------------------------------------
def encoder_forward():
    # TODO(synk): reference forward() is empty (`pass`); nothing to compute.
    return None


# ---------------------------------------------------------------------------
# Minimal Pallas kernel (identity / pass-through) — the degenerate "body"
# of the empty forward, used to validate the Pallas TPU path.
# ---------------------------------------------------------------------------
def _identity_kernel(x_ref, o_ref):
    o_ref[...] = x_ref[...]


def identity_passthrough(x, *, max_tile_bytes=4 << 20):
    """Copies x through VMEM in large, lane-dense row slabs via Pallas.

    The copy is HBM-bandwidth bound, so the tiling goal is simply the biggest
    row-slab that double-buffers (in + out) comfortably inside scoped VMEM on
    every generation (v5e/v6e: 16/32 MiB default scoped, v7x: 64 MiB physical).
    """
    m, n = x.shape
    bytes_per_row = n * x.dtype.itemsize

    # Largest multiple-of-8 row tile whose single buffer fits max_tile_bytes.
    tile_m = max(8, (max_tile_bytes // bytes_per_row) // 8 * 8)
    tile_m = min(tile_m, m)

    # Keep at least 2 grid steps when the array allows it, so the "parallel"
    # row axis can shard across v7x's 2 TensorCores (neutral on v5e/v6e).
    if m >= 16:
        tile_m = min(tile_m, max(8, ((m + 1) // 2) // 8 * 8))

    grid = (pl.cdiv(m, tile_m),)

    return pl.pallas_call(
        _identity_kernel,
        out_shape=jax.ShapeDtypeStruct((m, n), x.dtype),
        grid=grid,
        # Full column extent in one block: lane-dense, unmasked stores.
        in_specs=[pl.BlockSpec((tile_m, n), lambda i: (i, 0))],
        out_specs=pl.BlockSpec((tile_m, n), lambda i: (i, 0)),
        # Identity: let the output alias the input buffer (O(0) extra HBM
        # when the caller donates x; XLA inserts a copy otherwise).
        input_output_aliases={0: 0},
        compiler_params=pltpu.CompilerParams(
            dimension_semantics=("parallel",)
        ),
    )(x)


if __name__ == "__main__":
    # encoder has no parameters to initialize (empty __init__).
    # 1) Run the exact-semantics forward (returns None, like PyTorch).
    out = encoder_forward()
    assert out is None

    # 2) Exercise the Pallas identity kernel on a small deterministic input.
    key = jax.random.PRNGKey(0)
    x = jax.random.normal(key, (1024, 256), dtype=jnp.float32)  # 1 MiB
    y = identity_passthrough(x)
    jax.block_until_ready(y)
    assert y.shape == x.shape and y.dtype == x.dtype
    assert bool(jnp.allclose(y, x))

    print("KERNEL_OK")
</pallas_src>

<mosaic_0001>
module attributes {stable_mosaic.version = 11 : i64} {
  func.func @_identity_kernel(%arg0: i32, %arg1: memref<512x256xf32, #tpu.memory_space<vmem>>, %arg2: memref<512x256xf32, #tpu.memory_space<vmem>>) attributes {dimension_semantics = [#tpu.dimension_semantics<parallel>], iteration_bounds = array<i64: 2>, scalar_prefetch = 0 : i64, scratch_operands = 0 : i64, tpu.core_type = #tpu.core_type<tc>, window_params = [{transform_indices = @transform_0, window_bounds = array<i64: 512, 256>}, {transform_indices = @transform_1, window_bounds = array<i64: 512, 256>}]} {
    %c0 = arith.constant 0 : index
    %c0_0 = arith.constant 0 : index
    %0 = vector.load %arg1[%c0, %c0_0] : memref<512x256xf32, #tpu.memory_space<vmem>>, vector<512x256xf32>
    %c0_1 = arith.constant 0 : index
    %c0_2 = arith.constant 0 : index
    %1 = vector.load %arg2[%c0_1, %c0_2] : memref<512x256xf32, #tpu.memory_space<vmem>>, vector<512x256xf32>
    tpu.vector_store %arg2[%c0_1, %c0_2], %0 {strides = array<i32>} : memref<512x256xf32, #tpu.memory_space<vmem>>, vector<512x256xf32>,
    return
  }
  func.func @transform_0(%arg0: i32) -> (i32, i32) {
    %c0_i32 = arith.constant 0 : i32
    %c0_i32_0 = arith.constant 0 : i32
    return %arg0, %c0_i32 : i32, i32
  }
  func.func @transform_1(%arg0: i32) -> (i32, i32) {
    %c0_i32 = arith.constant 0 : i32
    %c0_i32_0 = arith.constant 0 : i32
    return %arg0, %c0_i32 : i32, i32
  }
}

</mosaic_0001>

<bundles_post_ra>
// kernel: tpu_custom_call.1
= control target key start
LH: loop header
LB: loop body
LE: loop exit
PB: predicated region body
PF: predicated region fallthrough
CT: control target
= control target key end

     0   :  { %6 = vsyncpa [#allocation3], 0  ;;  %s1056_s0 = inlined_call_operand.hbm [shape: f32[1024,256], index: 0, kind: input, shape index: {}, may-alias: {0,1}]   ;;  %s1057_s1 = inlined_call_operand.hbm [shape: f32[1024,256], index: 1, kind: output, shape index: {}, may-alias: {0,1}]  }
   0x1   :  { %8 = vsyncpa [#allocation3 + $0x1], 0 }
   0x2   :  { %9 = vsyncpa [#allocation4], 0 }
   0x3   :  { %11 = vsyncpa [#allocation4 + $0x1], 0  ;;  %s668_s6 = smov 0   ;;  %s670_s7 = smov 0  }
   0x4   :  { %s672_s8 = smov 0   ;;  %s674_s9 = smov 0  }
   0x5 LB: > { %s689_s10 = sadd.s32 4294967295, %s652_s9   ;;  %s486_s11 = sadd.s32 4294967294, %s652_s9   ;;  %s652_s9 = sphi %s674_s9, %s1067_s9   ;;  %s648_s8 = sphi %s672_s8, %s1066_s8   ;;  %s644_s7 = sphi %s670_s7, %s1065_s7   ;;  %s640_s6 = sphi %s668_s6, %s1064_s6  }
   0x6   : > { %s693_s12 = sadd.s32 1, %s652_s9   ;;  %s24_s13 = sadd.s32 1, %s648_s8 }
   0x7   : > { %s21_s14 = ssub.s32 %s652_s9, %s693_s12  ;;  %p31_p0 = scmp.ne.s32.totalorder %s648_s8, %s644_s7 }
   0x8   : > { %p22_p1 = scmp.eq.s32.totalorder %s21_s14, 0  ;;  %p32_p2 = scmp.eq.s32.totalorder %s652_s9, 0 }
   0x9   : > { %p37_p3 = scmp.ne.s32.totalorder %s644_s7, %s640_s6  ;;  %p38_p4 = scmp.eq.s32.totalorder %s689_s10, 0 }
   0xa   : > { %s705_s15 = scalar_select %p22_p1, %s648_s8, %s24_s13  }
   0xb   : > { %p707_p5 = por %p32_p2, %p31_p0  ;;  %p711_p6 = por %p38_p4, %p37_p3 }
   0xc   : > { %p61_p7 = scmp.eq.s32.totalorder %s689_s10, 1  ;;  %p67_p8 = scmp.eq.s32.totalorder %s486_s11, 1 }
   0xd   : > { %p518_p10 = scmp.lt.s32.totalorder %s652_s9, 2  ;;  %s87_s20 = sand.u32 1, %s648_s8  }
   0xe   : > { %p718_p11 = por %p61_p7, %p31_p0  ;;  %p722_p12 = por %p67_p8, %p37_p3 }
   0xf   : > { %s503_s21 = sshll.u32 %s652_s9, 10  ;;  %s489_s22 = sshll.u32 %s87_s20, 10 }
  0x10   : > { %s97_s25 = scalar_lea.hbm %s1056_s0, %s503_s21  ;;  %s91_s27 = scalar_lea.vmem [#allocation2], %s489_s22 }
  0x11   : > { %s98_s26 = sshll.u32 %s97_s25, 4  ;;  %s100_s28 = sshll.u32 %s91_s27, 4  ;;  %s99_s26 = int_to_ptr.hbm [resolvable:$true] %s98_s26  ;;  %s101_s28 = int_to_ptr.vmem [resolvable:$true] %s100_s28 }
  0x12   : > { %p733_p13 = pnand %p518_p10, %p707_p5  ;;  %p493_p0 = scmp.ge.s32.totalorder %s652_s9, 1 }
  0x13   : > { %p108_p1 = scmp.lt.s32.totalorder %s652_s9, 3  ;;  %s88_s30 = scalar_lea.sflag [#allocation3], %s87_s20 }
  0x14   : > { %s556_s2 = sshra.s32 %s99_s26, 4  ;;  %p560_p3 = pneg %p733_p13  ;;  %s557_s2 = int_to_ptr.hbm [resolvable:$true] %s556_s2 }
  0x15   : > { %s558_s3 = scalar_lea.hbm %s557_s2, 1024  ;;  %s563_s11 = scalar_lea.hbm %s1056_s0, 2048 }
  0x16   : > { %p559_p2 = scmp.ne.s32.totalorder %s557_s2, %s558_s3  ;;  %p564_p5 = scmp.lt.s32.totalorder %s557_s2, %s1056_s0 }
  0x17   : > { %p565_p8 = scmp.lt.s32.totalorder %s563_s11, %s558_s3 }
  0x18   : > { %p561_p4 = pnand %p560_p3, %p559_p2 }
  0x19   : > { %p566_p10 = por %p565_p8, %p564_p5 }
  0x1a   : > { %p562_p7 = pneg %p561_p4 }
  0x1c   : > { %p567_p9 = pnand %p566_p10, %p562_p7 }
  0x1e   : > { %570 = shalt.err (!%p567_p9)
}
  0x1f   : > { %s654_s16 = smov 256   ;;  %s655_s20 = smov 16  }
  0x20   : > { %513 = dma.hbm_to_vmem [thread:$0]  (!%p733_p13), %s99_s26, 16384, %s101_s28, %s88_s30, %s654_s16, %s654_s16, %s655_s20  }
  0x21   : > { %p109_p2 = pnand %p493_p0, %p108_p1 }
  0x22   : > { %s754_s21 = sand.u32 (!%p109_p2), 1, %s644_s7  }
  0x23   : > { %112 = sbr.rel (%p109_p2) target bundleno = 173 (0xad), region = 24  ;;  %s494_s22 = sshll.u32 (!%p109_p2), %s754_s21, 10 }
  0x24   : > { %s115_s23 = scalar_lea.sflag (!%p109_p2), [#allocation3], %s754_s21  ;;  %s758_s24 = scalar_lea.vmem (!%p109_p2), [#allocation2], %s494_s22 }
  0x28   : > { %631 = dma.done.wait (%p711_p6), %s115_s23, 16384  }
  0x29   : > { %633 = vsyncadd (%p711_p6), %s115_s23, 4294950912  ;;  %v140_v0 = vld [vmem:[%s758_s24] sm:$0xff]  ;;  %v141_v1 = vld [vmem:[%s758_s24 + $0x8] sm:$0xff]  ;;  %s767_s25 = scalar_lea.vmem [#allocation5], %s494_s22  ;;  %s505_s17 = sshll.u32 %s689_s10, 10 }
  0x2a   : > { %v142_v2 = vld [vmem:[%s758_s24 + $0x10] sm:$0xff]  ;;  %268 = vst [vmem:[%s767_s25] sm:$0xff] %v140_v0  ;;  %v143_v3 = vld [vmem:[%s758_s24 + $0x18] sm:$0xff]  ;;  %v144_v4 = vld [vmem:[%s758_s24 + $0x20] sm:$0xff]  ;;  %s409_s28 = scalar_lea.hbm %s1057_s1, %s505_s17  ;;  %s410_s10 = sshll.u32 %s767_s25, 4  ;;  %s411_s10 = int_to_ptr.vmem [resolvable:$true] %s410_s10 }
  0x2b   : > { %269 = vst [vmem:[%s767_s25 + $0x8] sm:$0xff] %v141_v1  ;;  %v145_v5 = vld [vmem:[%s758_s24 + $0x28] sm:$0xff]  ;;  %v146_v6 = vld [vmem:[%s758_s24 + $0x30] sm:$0xff]  ;;  %v147_v7 = vld [vmem:[%s758_s24 + $0x38] sm:$0xff]  ;;  %s412_s29 = sshll.u32 %s409_s28, 4  ;;  %s397_s30 = scalar_lea.sflag [#allocation4], %s754_s21  ;;  %s413_s29 = int_to_ptr.hbm [resolvable:$true] %s412_s29 }
  0x2c   : > { %270 = vst [vmem:[%s767_s25 + $0x10] sm:$0xff] %v142_v2  ;;  %v148_v8 = vld [vmem:[%s758_s24 + $0x40] sm:$0xff]  ;;  %v149_v9 = vld [vmem:[%s758_s24 + $0x48] sm:$0xff]  ;;  %v150_v10 = vld [vmem:[%s758_s24 + $0x50] sm:$0xff]  ;;  %s600_s2 = sshra.s32 %s413_s29, 4  ;;  %s606_s11 = scalar_lea.hbm %s1057_s1, 2048  ;;  %s601_s2 = int_to_ptr.hbm [resolvable:$true] %s600_s2 }
  0x2d   : > { %271 = vst [vmem:[%s767_s25 + $0x18] sm:$0xff] %v143_v3  ;;  %v151_v11 = vld [vmem:[%s758_s24 + $0x58] sm:$0xff]  ;;  %v152_v12 = vld [vmem:[%s758_s24 + $0x60] sm:$0xff]  ;;  %v153_v13 = vld [vmem:[%s758_s24 + $0x68] sm:$0xff]  ;;  %s602_s3 = scalar_lea.hbm %s601_s2, 1024  ;;  %p607_p0 = scmp.lt.s32.totalorder %s601_s2, %s1057_s1 }
  0x2e   : > { %272 = vst [vmem:[%s767_s25 + $0x20] sm:$0xff] %v144_v4  ;;  %v154_v14 = vld [vmem:[%s758_s24 + $0x70] sm:$0xff]  ;;  %v155_v15 = vld [vmem:[%s758_s24 + $0x78] sm:$0xff]  ;;  %v156_v16 = vld [vmem:[%s758_s24 + $0x80] sm:$0xff]  ;;  %p603_p6 = scmp.ne.s32.totalorder %s601_s2, %s602_s3  ;;  %p608_p1 = scmp.lt.s32.totalorder %s606_s11, %s602_s3 }
  0x2f   : > { %273 = vst [vmem:[%s767_s25 + $0x28] sm:$0xff] %v145_v5  ;;  %v157_v17 = vld [vmem:[%s758_s24 + $0x88] sm:$0xff]  ;;  %v158_v18 = vld [vmem:[%s758_s24 + $0x90] sm:$0xff]  ;;  %v159_v19 = vld [vmem:[%s758_s24 + $0x98] sm:$0xff] }
  0x30   : > { %274 = vst [vmem:[%s767_s25 + $0x30] sm:$0xff] %v146_v6  ;;  %v160_v20 = vld [vmem:[%s758_s24 + $0xa0] sm:$0xff]  ;;  %v161_v21 = vld [vmem:[%s758_s24 + $0xa8] sm:$0xff]  ;;  %v162_v22 = vld [vmem:[%s758_s24 + $0xb0] sm:$0xff]  ;;  %p604_p9 = pnand %p603_p6, %p718_p11  ;;  %p609_p3 = por %p608_p1, %p607_p0 }
  0x31   : > { %275 = vst [vmem:[%s767_s25 + $0x38] sm:$0xff] %v147_v7  ;;  %v163_v23 = vld [vmem:[%s758_s24 + $0xb8] sm:$0xff]  ;;  %v164_v24 = vld [vmem:[%s758_s24 + $0xc0] sm:$0xff]  ;;  %v165_v25 = vld [vmem:[%s758_s24 + $0xc8] sm:$0xff] }
  0x32   : > { %276 = vst [vmem:[%s767_s25 + $0x40] sm:$0xff] %v148_v8  ;;  %v166_v26 = vld [vmem:[%s758_s24 + $0xd0] sm:$0xff]  ;;  %v167_v27 = vld [vmem:[%s758_s24 + $0xd8] sm:$0xff]  ;;  %v168_v28 = vld [vmem:[%s758_s24 + $0xe0] sm:$0xff]  ;;  %p605_p13 = pneg %p604_p9 }
  0x33   : > { %277 = vst [vmem:[%s767_s25 + $0x48] sm:$0xff] %v149_v9  ;;  %v169_v29 = vld [vmem:[%s758_s24 + $0xe8] sm:$0xff]  ;;  %v170_v30 = vld [vmem:[%s758_s24 + $0xf0] sm:$0xff]  ;;  %v171_v31 = vld [vmem:[%s758_s24 + $0xf8] sm:$0xff] }
  0x34   : > { %278 = vst [vmem:[%s767_s25 + $0x50] sm:$0xff] %v150_v10  ;;  %v172_v32 = vld [vmem:[%s758_s24 + $0x100] sm:$0xff]  ;;  %v173_v33 = vld [vmem:[%s758_s24 + $0x108] sm:$0xff]  ;;  %v174_v34 = vld [vmem:[%s758_s24 + $0x110] sm:$0xff]  ;;  %p610_p4 = pnand %p609_p3, %p605_p13 }
  0x35   : > { %279 = vst [vmem:[%s767_s25 + $0x58] sm:$0xff] %v151_v11  ;;  %v175_v35 = vld [vmem:[%s758_s24 + $0x118] sm:$0xff]  ;;  %v176_v36 = vld [vmem:[%s758_s24 + $0x120] sm:$0xff]  ;;  %v177_v37 = vld [vmem:[%s758_s24 + $0x128] sm:$0xff] }
  0x36   : > { %280 = vst [vmem:[%s767_s25 + $0x60] sm:$0xff] %v152_v12  ;;  %v178_v38 = vld [vmem:[%s758_s24 + $0x130] sm:$0xff]  ;;  %v179_v39 = vld [vmem:[%s758_s24 + $0x138] sm:$0xff]  ;;  %v180_v40 = vld [vmem:[%s758_s24 + $0x140] sm:$0xff] }
  0x37   : > { %281 = vst [vmem:[%s767_s25 + $0x68] sm:$0xff] %v153_v13  ;;  %v181_v41 = vld [vmem:[%s758_s24 + $0x148] sm:$0xff]  ;;  %v182_v42 = vld [vmem:[%s758_s24 + $0x150] sm:$0xff]  ;;  %v183_v43 = vld [vmem:[%s758_s24 + $0x158] sm:$0xff] }
  0x38   : > { %282 = vst [vmem:[%s767_s25 + $0x70] sm:$0xff] %v154_v14  ;;  %v184_v44 = vld [vmem:[%s758_s24 + $0x160] sm:$0xff]  ;;  %v185_v45 = vld [vmem:[%s758_s24 + $0x168] sm:$0xff]  ;;  %v186_v46 = vld [vmem:[%s758_s24 + $0x170] sm:$0xff] }
  0x39   : > { %283 = vst [vmem:[%s767_s25 + $0x78] sm:$0xff] %v155_v15  ;;  %v187_v47 = vld [vmem:[%s758_s24 + $0x178] sm:$0xff]  ;;  %v188_v48 = vld [vmem:[%s758_s24 + $0x180] sm:$0xff]  ;;  %v189_v49 = vld [vmem:[%s758_s24 + $0x188] sm:$0xff] }
  0x3a   : > { %284 = vst [vmem:[%s767_s25 + $0x80] sm:$0xff] %v156_v16  ;;  %v190_v50 = vld [vmem:[%s758_s24 + $0x190] sm:$0xff]  ;;  %v191_v51 = vld [vmem:[%s758_s24 + $0x198] sm:$0xff]  ;;  %v192_v52 = vld [vmem:[%s758_s24 + $0x1a0] sm:$0xff] }
  0x3b   : > { %285 = vst [vmem:[%s767_s25 + $0x88] sm:$0xff] %v157_v17  ;;  %v193_v53 = vld [vmem:[%s758_s24 + $0x1a8] sm:$0xff]  ;;  %v194_v54 = vld [vmem:[%s758_s24 + $0x1b0] sm:$0xff]  ;;  %v195_v55 = vld [vmem:[%s758_s24 + $0x1b8] sm:$0xff] }
  0x3c   : > { %286 = vst [vmem:[%s767_s25 + $0x90] sm:$0xff] %v158_v18  ;;  %v196_v56 = vld [vmem:[%s758_s24 + $0x1c0] sm:$0xff]  ;;  %v197_v57 = vld [vmem:[%s758_s24 + $0x1c8] sm:$0xff]  ;;  %v198_v58 = vld [vmem:[%s758_s24 + $0x1d0] sm:$0xff] }
  0x3d   : > { %287 = vst [vmem:[%s767_s25 + $0x98] sm:$0xff] %v159_v19  ;;  %v199_v59 = vld [vmem:[%s758_s24 + $0x1d8] sm:$0xff]  ;;  %v200_v60 = vld [vmem:[%s758_s24 + $0x1e0] sm:$0xff]  ;;  %v201_v61 = vld [vmem:[%s758_s24 + $0x1e8] sm:$0xff] }
  0x3e   : > { %288 = vst [vmem:[%s767_s25 + $0xa0] sm:$0xff] %v160_v20  ;;  %v202_v62 = vld [vmem:[%s758_s24 + $0x1f0] sm:$0xff]  ;;  %v203_v63 = vld [vmem:[%s758_s24 + $0x1f8] sm:$0xff]  ;;  %v204_v0 = vld [vmem:[%s758_s24 + $0x200] sm:$0xff] }
  0x3f   : > { %289 = vst [vmem:[%s767_s25 + $0xa8] sm:$0xff] %v161_v21  ;;  %v205_v1 = vld [vmem:[%s758_s24 + $0x208] sm:$0xff]  ;;  %v206_v2 = vld [vmem:[%s758_s24 + $0x210] sm:$0xff]  ;;  %v207_v3 = vld [vmem:[%s758_s24 + $0x218] sm:$0xff] }
  0x40   : > { %290 = vst [vmem:[%s767_s25 + $0xb0] sm:$0xff] %v162_v22  ;;  %v208_v4 = vld [vmem:[%s758_s24 + $0x220] sm:$0xff]  ;;  %v209_v5 = vld [vmem:[%s758_s24 + $0x228] sm:$0xff]  ;;  %v210_v6 = vld [vmem:[%s758_s24 + $0x230] sm:$0xff] }
  0x41   : > { %291 = vst [vmem:[%s767_s25 + $0xb8] sm:$0xff] %v163_v23  ;;  %v211_v7 = vld [vmem:[%s758_s24 + $0x238] sm:$0xff]  ;;  %v212_v8 = vld [vmem:[%s758_s24 + $0x240] sm:$0xff]  ;;  %v213_v9 = vld [vmem:[%s758_s24 + $0x248] sm:$0xff] }
  0x42   : > { %292 = vst [vmem:[%s767_s25 + $0xc0] sm:$0xff] %v164_v24  ;;  %v214_v10 = vld [vmem:[%s758_s24 + $0x250] sm:$0xff]  ;;  %v215_v11 = vld [vmem:[%s758_s24 + $0x258] sm:$0xff]  ;;  %v216_v12 = vld [vmem:[%s758_s24 + $0x260] sm:$0xff] }
  0x43   : > { %293 = vst [vmem:[%s767_s25 + $0xc8] sm:$0xff] %v165_v25  ;;  %v217_v13 = vld [vmem:[%s758_s24 + $0x268] sm:$0xff]  ;;  %v218_v14 = vld [vmem:[%s758_s24 + $0x270] sm:$0xff]  ;;  %v219_v15 = vld [vmem:[%s758_s24 + $0x278] sm:$0xff] }
  0x44   : > { %294 = vst [vmem:[%s767_s25 + $0xd0] sm:$0xff] %v166_v26  ;;  %v220_v16 = vld [vmem:[%s758_s24 + $0x280] sm:$0xff]  ;;  %v221_v17 = vld [vmem:[%s758_s24 + $0x288] sm:$0xff]  ;;  %v222_v18 = vld [vmem:[%s758_s24 + $0x290] sm:$0xff] }
  0x45   : > { %295 = vst [vmem:[%s767_s25 + $0xd8] sm:$0xff] %v167_v27  ;;  %v223_v19 = vld [vmem:[%s758_s24 + $0x298] sm:$0xff]  ;;  %v224_v20 = vld [vmem:[%s758_s24 + $0x2a0] sm:$0xff]  ;;  %v225_v21 = vld [vmem:[%s758_s24 + $0x2a8] sm:$0xff] }
  0x46   : > { %296 = vst [vmem:[%s767_s25 + $0xe0] sm:$0xff] %v168_v28  ;;  %v226_v22 = vld [vmem:[%s758_s24 + $0x2b0] sm:$0xff]  ;;  %v227_v23 = vld [vmem:[%s758_s24 + $0x2b8] sm:$0xff]  ;;  %v228_v24 = vld [vmem:[%s758_s24 + $0x2c0] sm:$0xff] }
  0x47   : > { %297 = vst [vmem:[%s767_s25 + $0xe8] sm:$0xff] %v169_v29  ;;  %v229_v25 = vld [vmem:[%s758_s24 + $0x2c8] sm:$0xff]  ;;  %v230_v26 = vld [vmem:[%s758_s24 + $0x2d0] sm:$0xff]  ;;  %v231_v27 = vld [vmem:[%s758_s24 + $0x2d8] sm:$0xff] }
  0x48   : > { %298 = vst [vmem:[%s767_s25 + $0xf0] sm:$0xff] %v170_v30  ;;  %v232_v28 = vld [vmem:[%s758_s24 + $0x2e0] sm:$0xff]  ;;  %v233_v29 = vld [vmem:[%s758_s24 + $0x2e8] sm:$0xff]  ;;  %v234_v30 = vld [vmem:[%s758_s24 + $0x2f0] sm:$0xff] }
  0x49   : > { %299 = vst [vmem:[%s767_s25 + $0xf8] sm:$0xff] %v171_v31  ;;  %v235_v31 = vld [vmem:[%s758_s24 + $0x2f8] sm:$0xff] }
  0x4a   : > { %300 = vst [vmem:[%s767_s25 + $0x100] sm:$0xff] %v172_v32  ;;  %v236_v32 = vld [vmem:[%s758_s24 + $0x300] sm:$0xff] }
  0x4b   : > { %301 = vst [vmem:[%s767_s25 + $0x108] sm:$0xff] %v173_v33  ;;  %v237_v33 = vld [vmem:[%s758_s24 + $0x308] sm:$0xff] }
  0x4c   : > { %302 = vst [vmem:[%s767_s25 + $0x110] sm:$0xff] %v174_v34  ;;  %v238_v34 = vld [vmem:[%s758_s24 + $0x310] sm:$0xff] }
  0x4d   : > { %303 = vst [vmem:[%s767_s25 + $0x118] sm:$0xff] %v175_v35  ;;  %v239_v35 = vld [vmem:[%s758_s24 + $0x318] sm:$0xff] }
  0x4e   : > { %304 = vst [vmem:[%s767_s25 + $0x120] sm:$0xff] %v176_v36  ;;  %v240_v36 = vld [vmem:[%s758_s24 + $0x320] sm:$0xff] }
  0x4f   : > { %305 = vst [vmem:[%s767_s25 + $0x128] sm:$0xff] %v177_v37  ;;  %v241_v37 = vld [vmem:[%s758_s24 + $0x328] sm:$0xff] }
  0x50   : > { %306 = vst [vmem:[%s767_s25 + $0x130] sm:$0xff] %v178_v38  ;;  %v242_v38 = vld [vmem:[%s758_s24 + $0x330] sm:$0xff] }
  0x51   : > { %307 = vst [vmem:[%s767_s25 + $0x138] sm:$0xff] %v179_v39  ;;  %v243_v39 = vld [vmem:[%s758_s24 + $0x338] sm:$0xff] }
  0x52   : > { %308 = vst [vmem:[%s767_s25 + $0x140] sm:$0xff] %v180_v40  ;;  %v244_v40 = vld [vmem:[%s758_s24 + $0x340] sm:$0xff] }
  0x53   : > { %309 = vst [vmem:[%s767_s25 + $0x148] sm:$0xff] %v181_v41  ;;  %v245_v41 = vld [vmem:[%s758_s24 + $0x348] sm:$0xff] }
  0x54   : > { %310 = vst [vmem:[%s767_s25 + $0x150] sm:$0xff] %v182_v42  ;;  %v246_v42 = vld [vmem:[%s758_s24 + $0x350] sm:$0xff] }
  0x55   : > { %311 = vst [vmem:[%s767_s25 + $0x158] sm:$0xff] %v183_v43  ;;  %v247_v43 = vld [vmem:[%s758_s24 + $0x358] sm:$0xff] }
  0x56   : > { %312 = vst [vmem:[%s767_s25 + $0x160] sm:$0xff] %v184_v44  ;;  %v248_v44 = vld [vmem:[%s758_s24 + $0x360] sm:$0xff] }
  0x57   : > { %313 = vst [vmem:[%s767_s25 + $0x168] sm:$0xff] %v185_v45  ;;  %v249_v45 = vld [vmem:[%s758_s24 + $0x368] sm:$0xff] }
  0x58   : > { %314 = vst [vmem:[%s767_s25 + $0x170] sm:$0xff] %v186_v46  ;;  %v250_v46 = vld [vmem:[%s758_s24 + $0x370] sm:$0xff] }
  0x59   : > { %315 = vst [vmem:[%s767_s25 + $0x178] sm:$0xff] %v187_v47  ;;  %v251_v47 = vld [vmem:[%s758_s24 + $0x378] sm:$0xff] }
  0x5a   : > { %316 = vst [vmem:[%s767_s25 + $0x180] sm:$0xff] %v188_v48  ;;  %v252_v48 = vld [vmem:[%s758_s24 + $0x380] sm:$0xff] }
  0x5b   : > { %317 = vst [vmem:[%s767_s25 + $0x188] sm:$0xff] %v189_v49  ;;  %v253_v49 = vld [vmem:[%s758_s24 + $0x388] sm:$0xff] }
  0x5c   : > { %318 = vst [vmem:[%s767_s25 + $0x190] sm:$0xff] %v190_v50  ;;  %v254_v50 = vld [vmem:[%s758_s24 + $0x390] sm:$0xff] }
  0x5d   : > { %319 = vst [vmem:[%s767_s25 + $0x198] sm:$0xff] %v191_v51  ;;  %v255_v51 = vld [vmem:[%s758_s24 + $0x398] sm:$0xff] }
  0x5e   : > { %320 = vst [vmem:[%s767_s25 + $0x1a0] sm:$0xff] %v192_v52  ;;  %v256_v52 = vld [vmem:[%s758_s24 + $0x3a0] sm:$0xff] }
  0x5f   : > { %321 = vst [vmem:[%s767_s25 + $0x1a8] sm:$0xff] %v193_v53  ;;  %v257_v53 = vld [vmem:[%s758_s24 + $0x3a8] sm:$0xff] }
  0x60   : > { %322 = vst [vmem:[%s767_s25 + $0x1b0] sm:$0xff] %v194_v54  ;;  %v258_v54 = vld [vmem:[%s758_s24 + $0x3b0] sm:$0xff] }
  0x61   : > { %323 = vst [vmem:[%s767_s25 + $0x1b8] sm:$0xff] %v195_v55  ;;  %v259_v55 = vld [vmem:[%s758_s24 + $0x3b8] sm:$0xff] }
  0x62   : > { %324 = vst [vmem:[%s767_s25 + $0x1c0] sm:$0xff] %v196_v56  ;;  %v260_v56 = vld [vmem:[%s758_s24 + $0x3c0] sm:$0xff] }
  0x63   : > { %325 = vst [vmem:[%s767_s25 + $0x1c8] sm:$0xff] %v197_v57  ;;  %v261_v57 = vld [vmem:[%s758_s24 + $0x3c8] sm:$0xff] }
  0x64   : > { %326 = vst [vmem:[%s767_s25 + $0x1d0] sm:$0xff] %v198_v58  ;;  %v262_v58 = vld [vmem:[%s758_s24 + $0x3d0] sm:$0xff] }
  0x65   : > { %327 = vst [vmem:[%s767_s25 + $0x1d8] sm:$0xff] %v199_v59  ;;  %v263_v59 = vld [vmem:[%s758_s24 + $0x3d8] sm:$0xff] }
  0x66   : > { %328 = vst [vmem:[%s767_s25 + $0x1e0] sm:$0xff] %v200_v60  ;;  %v264_v60 = vld [vmem:[%s758_s24 + $0x3e0] sm:$0xff] }
  0x67   : > { %329 = vst [vmem:[%s767_s25 + $0x1e8] sm:$0xff] %v201_v61  ;;  %v265_v61 = vld [vmem:[%s758_s24 + $0x3e8] sm:$0xff] }
  0x68   : > { %330 = vst [vmem:[%s767_s25 + $0x1f0] sm:$0xff] %v202_v62  ;;  %v266_v62 = vld [vmem:[%s758_s24 + $0x3f0] sm:$0xff] }
  0x69   : > { %331 = vst [vmem:[%s767_s25 + $0x1f8] sm:$0xff] %v203_v63  ;;  %v267_v63 = vld [vmem:[%s758_s24 + $0x3f8] sm:$0xff] }
  0x6a   : > { %332 = vst [vmem:[%s767_s25 + $0x200] sm:$0xff] %v204_v0 }
  0x6b   : > { %333 = vst [vmem:[%s767_s25 + $0x208] sm:$0xff] %v205_v1 }
  0x6c   : > { %334 = vst [vmem:[%s767_s25 + $0x210] sm:$0xff] %v206_v2 }
  0x6d   : > { %335 = vst [vmem:[%s767_s25 + $0x218] sm:$0xff] %v207_v3 }
  0x6e   : > { %336 = vst [vmem:[%s767_s25 + $0x220] sm:$0xff] %v208_v4 }
  0x6f   : > { %337 = vst [vmem:[%s767_s25 + $0x228] sm:$0xff] %v209_v5 }
  0x70   : > { %338 = vst [vmem:[%s767_s25 + $0x230] sm:$0xff] %v210_v6 }
  0x71   : > { %339 = vst [vmem:[%s767_s25 + $0x238] sm:$0xff] %v211_v7 }
  0x72   : > { %340 = vst [vmem:[%s767_s25 + $0x240] sm:$0xff] %v212_v8 }
  0x73   : > { %341 = vst [vmem:[%s767_s25 + $0x248] sm:$0xff] %v213_v9 }
  0x74   : > { %342 = vst [vmem:[%s767_s25 + $0x250] sm:$0xff] %v214_v10 }
  0x75   : > { %343 = vst [vmem:[%s767_s25 + $0x258] sm:$0xff] %v215_v11 }
  0x76   : > { %344 = vst [vmem:[%s767_s25 + $0x260] sm:$0xff] %v216_v12 }
  0x77   : > { %345 = vst [vmem:[%s767_s25 + $0x268] sm:$0xff] %v217_v13 }
  0x78   : > { %346 = vst [vmem:[%s767_s25 + $0x270] sm:$0xff] %v218_v14 }
  0x79   : > { %347 = vst [vmem:[%s767_s25 + $0x278] sm:$0xff] %v219_v15 }
  0x7a   : > { %348 = vst [vmem:[%s767_s25 + $0x280] sm:$0xff] %v220_v16 }
  0x7b   : > { %349 = vst [vmem:[%s767_s25 + $0x288] sm:$0xff] %v221_v17 }
  0x7c   : > { %350 = vst [vmem:[%s767_s25 + $0x290] sm:$0xff] %v222_v18 }
  0x7d   : > { %351 = vst [vmem:[%s767_s25 + $0x298] sm:$0xff] %v223_v19 }
  0x7e   : > { %352 = vst [vmem:[%s767_s25 + $0x2a0] sm:$0xff] %v224_v20 }
  0x7f   : > { %353 = vst [vmem:[%s767_s25 + $0x2a8] sm:$0xff] %v225_v21 }
  0x80   : > { %354 = vst [vmem:[%s767_s25 + $0x2b0] sm:$0xff] %v226_v22 }
  0x81   : > { %355 = vst [vmem:[%s767_s25 + $0x2b8] sm:$0xff] %v227_v23 }
  0x82   : > { %356 = vst [vmem:[%s767_s25 + $0x2c0] sm:$0xff] %v228_v24 }
  0x83   : > { %357 = vst [vmem:[%s767_s25 + $0x2c8] sm:$0xff] %v229_v25 }
  0x84   : > { %358 = vst [vmem:[%s767_s25 + $0x2d0] sm:$0xff] %v230_v26 }
  0x85   : > { %359 = vst [vmem:[%s767_s25 + $0x2d8] sm:$0xff] %v231_v27 }
  0x86   : > { %360 = vst [vmem:[%s767_s25 + $0x2e0] sm:$0xff] %v232_v28 }
  0x87   : > { %361 = vst [vmem:[%s767_s25 + $0x2e8] sm:$0xff] %v233_v29 }
  0x88   : > { %362 = vst [vmem:[%s767_s25 + $0x2f0] sm:$0xff] %v234_v30 }
  0x89   : > { %363 = vst [vmem:[%s767_s25 + $0x2f8] sm:$0xff] %v235_v31 }
  0x8a   : > { %364 = vst [vmem:[%s767_s25 + $0x300] sm:$0xff] %v236_v32 }
  0x8b   : > { %365 = vst [vmem:[%s767_s25 + $0x308] sm:$0xff] %v237_v33 }
  0x8c   : > { %366 = vst [vmem:[%s767_s25 + $0x310] sm:$0xff] %v238_v34 }
  0x8d   : > { %367 = vst [vmem:[%s767_s25 + $0x318] sm:$0xff] %v239_v35 }
  0x8e   : > { %368 = vst [vmem:[%s767_s25 + $0x320] sm:$0xff] %v240_v36 }
  0x8f   : > { %369 = vst [vmem:[%s767_s25 + $0x328] sm:$0xff] %v241_v37 }
  0x90   : > { %370 = vst [vmem:[%s767_s25 + $0x330] sm:$0xff] %v242_v38 }
  0x91   : > { %371 = vst [vmem:[%s767_s25 + $0x338] sm:$0xff] %v243_v39 }
  0x92   : > { %372 = vst [vmem:[%s767_s25 + $0x340] sm:$0xff] %v244_v40 }
  0x93   : > { %373 = vst [vmem:[%s767_s25 + $0x348] sm:$0xff] %v245_v41 }
  0x94   : > { %374 = vst [vmem:[%s767_s25 + $0x350] sm:$0xff] %v246_v42 }
  0x95   : > { %375 = vst [vmem:[%s767_s25 + $0x358] sm:$0xff] %v247_v43 }
  0x96   : > { %376 = vst [vmem:[%s767_s25 + $0x360] sm:$0xff] %v248_v44 }
  0x97   : > { %377 = vst [vmem:[%s767_s25 + $0x368] sm:$0xff] %v249_v45 }
  0x98   : > { %378 = vst [vmem:[%s767_s25 + $0x370] sm:$0xff] %v250_v46 }
  0x99   : > { %379 = vst [vmem:[%s767_s25 + $0x378] sm:$0xff] %v251_v47 }
  0x9a   : > { %380 = vst [vmem:[%s767_s25 + $0x380] sm:$0xff] %v252_v48 }
  0x9b   : > { %381 = vst [vmem:[%s767_s25 + $0x388] sm:$0xff] %v253_v49 }
  0x9c   : > { %382 = vst [vmem:[%s767_s25 + $0x390] sm:$0xff] %v254_v50 }
  0x9d   : > { %383 = vst [vmem:[%s767_s25 + $0x398] sm:$0xff] %v255_v51 }
  0x9e   : > { %384 = vst [vmem:[%s767_s25 + $0x3a0] sm:$0xff] %v256_v52 }
  0x9f   : > { %385 = vst [vmem:[%s767_s25 + $0x3a8] sm:$0xff] %v257_v53 }
  0xa0   : > { %386 = vst [vmem:[%s767_s25 + $0x3b0] sm:$0xff] %v258_v54 }
  0xa1   : > { %387 = vst [vmem:[%s767_s25 + $0x3b8] sm:$0xff] %v259_v55 }
  0xa2   : > { %388 = vst [vmem:[%s767_s25 + $0x3c0] sm:$0xff] %v260_v56 }
  0xa3   : > { %389 = vst [vmem:[%s767_s25 + $0x3c8] sm:$0xff] %v261_v57 }
  0xa4   : > { %390 = vst [vmem:[%s767_s25 + $0x3d0] sm:$0xff] %v262_v58 }
  0xa5   : > { %391 = vst [vmem:[%s767_s25 + $0x3d8] sm:$0xff] %v263_v59 }
  0xa6   : > { %392 = vst [vmem:[%s767_s25 + $0x3e0] sm:$0xff] %v264_v60 }
  0xa7   : > { %393 = vst [vmem:[%s767_s25 + $0x3e8] sm:$0xff] %v265_v61 }
  0xa8   : > { %394 = vst [vmem:[%s767_s25 + $0x3f0] sm:$0xff] %v266_v62 }
  0xa9   : > { %395 = vst [vmem:[%s767_s25 + $0x3f8] sm:$0xff] %v267_v63 }
  0xaa   : > { %613 = shalt.err (!%p610_p4)
}
  0xab   : > { %s656_s16 = smov 256   ;;  %s657_s20 = smov 16  }
  0xac   : > { %508 = dma.vmem_to_hbm [thread:$0]  (%p718_p11), %s411_s10, 16384, %s413_s29, %s397_s30, %s656_s16, %s656_s16, %s657_s20  }
  0xad PF: > { %s427_s21 = sand.u32 1, %s640_s6   ;;  %p1063_p7 = scmp.ge.s32.totalorder %s652_s9, 2 }
  0xae   : > { %s428_s22 = scalar_lea.sflag [#allocation4], %s427_s21 }
  0xaf   : > { %p515_p5 = pnand %p1063_p7, %p722_p12 }
  0xb1   : > { %p516_p8 = pneg %p515_p5 }
  0xb3   : > { %635 = dma.done.wait (%p516_p8), %s428_s22, 16384  }
  0xb4   : > { %637 = vsyncadd (%p516_p8), %s428_s22, 4294950912  ;;  %p14_p10 = scmp.ge.s32.totalorder %s693_s12, 4   ;;  %s1064_s6 = smov %s644_s7 }
  0xb5   : > { %s1065_s7 = smov %s648_s8  ;;  %s1066_s8 = smov %s705_s15 }
  0xb6   : > { %s1067_s9 = smov %s693_s12  ;;  %16 = sbr.rel (!%p14_p10) target bundleno = 5 (0x5), region = 69 }
  0xbb   :  { %434 = vsyncpa [#allocation3], 1 }
  0xbc   :  { %436 = vsyncpa [#allocation3 + $0x1], 1 }
  0xbd   :  { %437 = vsyncpa [#allocation4], 1 }
  0xbe   :  { %439 = vsyncpa [#allocation4 + $0x1], 1 }

</bundles_post_ra>
